<compile_context>
chip_gen: v7x
topology: tpu7x:2x2x1
jax: 0.10.0
libtpu: 0.0.40
codegen_flags: <defaults>
</compile_context>

<pallas_src>
import functools

import numpy as np
import jax
import jax.numpy as jnp
from jax import lax
from jax.experimental import pallas as pl
from jax.experimental.pallas import tpu as pltpu


def _dsconv_kernel(x_ref, w_ref, o_ref, *, B, C, H, W, K):
    """Depthwise-separable conv on the BlockSpec-selected middle frame.

    x_ref: (B, C, H*W)   middle frame, spatial dims flattened (lane-dense)
    w_ref: (B*C, NCOL)   packed f32 weights:
             cols [t*HW, (t+1)*HW) : fused mask*w_dw plane for tap t
             col  KK*HW            : depthwise bias (per-row channel value)
             cols KK*HW+1 .. +C    : pointwise weight column ci (w_pw[:, ci])
             col  KK*HW+1+C        : pointwise bias
    o_ref: (B*C, H*W)
    """
    HW = H * W
    KK = K * K
    pad = K // 2

    # Fold batch into sublanes: (B, C, HW) -> (B*C, HW).  One small sublane
    # concat; afterwards every op runs on full 8-sublane vregs.
    x = jnp.concatenate([x_ref[b].astype(jnp.float32) for b in range(B)],
                        axis=0)                                   # (B*C, HW)

    # Depthwise KxK: per tap one lane rotation (XLU slot, overlaps the VPU
    # mul-adds) + one mul + one add.  Edge masks are pre-fused into the tap
    # planes in the wrapper, so there is no separate mask multiply.
    acc = jnp.zeros_like(x)
    for kh in range(K):
        for kw in range(K):
            t = kh * K + kw
            dh, dw = kh - pad, kw - pad
            shift = (-(dh * W + dw)) % HW
            shifted = pltpu.roll(x, shift, 1) if shift else x
            acc = acc + w_ref[:, t * HW:(t + 1) * HW] * shifted
    acc = acc + w_ref[:, KK * HW:KK * HW + 1]            # depthwise bias

    # Pointwise 1x1 as unrolled VPU multiply-adds (MXU tile would be
    # degenerate at C=4; for production C >= 128 use a tiled jnp.dot with an
    # f32 accumulator instead).
    base = KK * HW + 1
    wcols = [w_ref[0:C, base + ci:base + ci + 1] for ci in range(C)]   # (C,1)
    bpw = w_ref[0:C, base + C:base + C + 1]                            # (C,1)
    outs = []
    for b in range(B):
        ob = jnp.zeros((C, HW), jnp.float32)
        for ci in range(C):
            ob = ob + wcols[ci] * acc[b * C + ci:b * C + ci + 1, :]
        outs.append(ob + bpw)
    out = jnp.concatenate(outs, axis=0)                               # (B*C, HW)

    o_ref[...] = out.astype(o_ref.dtype)  # single full-vreg, lane-dense store


def _pack_weights(w_dw, b_dw, w_pw, b_pw, *, B, H, W):
    """Pack all parameters into one lane-major f32 array of shape (B*C, NCOL).

    The zero-padding edge mask of each 3x3 tap is fused into the depthwise
    weight here, and everything is tiled over the batch so the kernel's rows
    line up with the folded (B*C, HW) activation slab.  This is a tiny
    one-time op over <100 KB of weights, not a pass over activations.
    """
    C, K, _ = w_dw.shape
    HW = H * W
    KK = K * K
    pad = K // 2

    hh, ww = np.meshgrid(np.arange(H), np.arange(W), indexing="ij")
    hh = hh.reshape(-1)
    ww = ww.reshape(-1)
    masks = np.empty((KK, HW), np.float32)
    for kh in range(K):
        for kw in range(K):
            dh, dw = kh - pad, kw - pad
            m = ((hh + dh >= 0) & (hh + dh < H) &
                 (ww + dw >= 0) & (ww + dw < W))
            masks[kh * K + kw] = m.astype(np.float32)
    masks = jnp.asarray(masks)                                     # (KK, HW)

    taps = jnp.transpose(w_dw.reshape(C, KK).astype(jnp.float32))  # (KK, C)
    planes = taps[:, :, None] * masks[:, None, :]                  # (KK, C, HW)
    planes = jnp.tile(planes, (1, B, 1))                           # (KK, B*C, HW)
    planes = jnp.transpose(planes, (1, 0, 2)).reshape(B * C, KK * HW)

    bdw_col = jnp.tile(b_dw.reshape(C, 1).astype(jnp.float32), (B, 1))
    wpw_cols = jnp.tile(w_pw.astype(jnp.float32), (B, 1))          # col ci = w_pw[:, ci]
    bpw_col = jnp.tile(b_pw.reshape(C, 1).astype(jnp.float32), (B, 1))

    return jnp.concatenate([planes, bdw_col, wpw_cols, bpw_col], axis=1)


def temporal_conv_block(x, w_dw, b_dw, w_pw, b_pw):
    """x: (B, T, C, H, W).  Weight shapes follow nn.Conv2d (squeezed):
       w_dw (C, K, K), b_dw (C,), w_pw (C_out=C, C_in=C), b_pw (C,)."""
    B, T, C, H, W = x.shape
    K = w_dw.shape[-1]
    HW = H * W
    mid = T // 2

    x_flat = x.reshape(B, T, C, HW)                # metadata-only reshape
    wpacked = _pack_weights(w_dw, b_dw, w_pw, b_pw, B=B, H=H, W=W)
    ncol = wpacked.shape[1]

    kernel = functools.partial(_dsconv_kernel, B=B, C=C, H=H, W=W, K=K)

    out = pl.pallas_call(
        kernel,
        out_shape=jax.ShapeDtypeStruct((B * C, HW), x.dtype),
        grid=(1,),
        in_specs=[
            # Middle-frame selection directly in the BlockSpec (squeezed T
            # dim): only that frame is DMA'd from HBM.
            pl.BlockSpec((B, None, C, HW), lambda i: (0, mid, 0, 0)),
            # All weights/biases in one packed array -> one DMA.
            pl.BlockSpec((B * C, ncol), lambda i: (0, 0)),
        ],
        out_specs=pl.BlockSpec((B * C, HW), lambda i: (0, 0)),
        compiler_params=pltpu.CompilerParams(
            dimension_semantics=("arbitrary",)),
        # Production sizes: add a "parallel" grid axis over B / H-row tiles
        # (v7x dual-TC) and set vmem_limit_bytes for the 64 MiB v7x VMEM.
    )(x_flat, wpacked)
    return out.reshape(B, C, H, W)


def _reference(x, w_dw, b_dw, w_pw, b_pw):
    """Pure-JAX reference matching the PyTorch forward."""
    B, T, C, H, W = x.shape
    K = w_dw.shape[-1]
    frame = x[:, T // 2]                                           # NCHW
    dw = lax.conv_general_dilated(
        frame, w_dw.reshape(C, 1, K, K),
        window_strides=(1, 1), padding=((K // 2, K // 2), (K // 2, K // 2)),
        dimension_numbers=("NCHW", "OIHW", "NCHW"),
        feature_group_count=C)
    dw = dw + b_dw.reshape(1, C, 1, 1)
    pw = lax.conv_general_dilated(
        dw, w_pw.reshape(C, C, 1, 1),
        window_strides=(1, 1), padding=((0, 0), (0, 0)),
        dimension_numbers=("NCHW", "OIHW", "NCHW"))
    return pw + b_pw.reshape(1, C, 1, 1)


if __name__ == "__main__":
    B, T, C, H, W = 2, 4, 4, 16, 16
    K = 3

    key = jax.random.PRNGKey(0)
    kx, k1, k2, k3, k4 = jax.random.split(key, 5)

    x = jax.random.normal(kx, (B, T, C, H, W), dtype=jnp.float32)
    # Parameter shapes mirror nn.Conv2d: depthwise (C,1,K,K)->(C,K,K),
    # pointwise (C,C,1,1)->(C,C), biases (C,)
    w_dw = jax.random.normal(k1, (C, K, K), dtype=jnp.float32) * 0.1
    b_dw = jax.random.normal(k2, (C,), dtype=jnp.float32) * 0.1
    w_pw = jax.random.normal(k3, (C, C), dtype=jnp.float32) * 0.1
    b_pw = jax.random.normal(k4, (C,), dtype=jnp.float32) * 0.1

    out = temporal_conv_block(x, w_dw, b_dw, w_pw, b_pw)
    out = jax.block_until_ready(out)

    ref = _reference(x, w_dw, b_dw, w_pw, b_pw)
    assert out.shape == (B, C, H, W)
    assert jnp.allclose(out, ref, atol=1e-4, rtol=1e-4), "mismatch vs reference"

    print("KERNEL_OK")
</pallas_src>

<mosaic_0001>
module attributes {stable_mosaic.version = 11 : i64} {
  func.func @_dsconv_kernel(%arg0: i32, %arg1: memref<2x1x4x256xf32, #tpu.memory_space<vmem>>, %arg2: memref<8x2310xf32, #tpu.memory_space<vmem>>, %arg3: memref<8x256xf32, #tpu.memory_space<vmem>>) attributes {dimension_semantics = [#tpu.dimension_semantics<arbitrary>], iteration_bounds = array<i64: 1>, scalar_prefetch = 0 : i64, scratch_operands = 0 : i64, tpu.core_type = #tpu.core_type<tc>, window_params = [{transform_indices = @transform_0, window_bounds = array<i64: 2, 1, 4, 256>}, {pipeline_mode = #tpu.pipeline_mode<synchronous>, transform_indices = @transform_1, window_bounds = array<i64: 8, 2310>}, {pipeline_mode = #tpu.pipeline_mode<synchronous>, transform_indices = @transform_2, window_bounds = array<i64: 8, 256>}]} {
    %c0 = arith.constant 0 : index
    %c0_0 = arith.constant 0 : index
    %c0_1 = arith.constant 0 : index
    %c0_2 = arith.constant 0 : index
    %0 = vector.load %arg1[%c0, %c0_0, %c0_1, %c0_2] : memref<2x1x4x256xf32, #tpu.memory_space<vmem>>, vector<1x1x4x256xf32>
    %1 = vector.shape_cast %0 : vector<1x1x4x256xf32> to vector<4x256xf32>
    %c1 = arith.constant 1 : index
    %c0_3 = arith.constant 0 : index
    %c0_4 = arith.constant 0 : index
    %c0_5 = arith.constant 0 : index
    %2 = vector.load %arg1[%c1, %c0_3, %c0_4, %c0_5] : memref<2x1x4x256xf32, #tpu.memory_space<vmem>>, vector<1x1x4x256xf32>
    %3 = vector.shape_cast %2 : vector<1x1x4x256xf32> to vector<4x256xf32>
    %4 = tpu.concatenate %1, %3 in 0 : vector<4x256xf32>, vector<4x256xf32> -> vector<8x256xf32>
    %cst = arith.constant 0.000000e+00 : f32
    %5 = vector.broadcast %cst : f32 to vector<8x256xf32>
    %c17_i32 = arith.constant 17 : i32
    %6 = tpu.dynamic_rotate %4 by %c17_i32 dim 1 : vector<8x256xf32>, i32 -> vector<8x256xf32>
    %c0_6 = arith.constant 0 : index
    %c0_7 = arith.constant 0 : index
    %7 = vector.load %arg2[%c0_6, %c0_7] : memref<8x2310xf32, #tpu.memory_space<vmem>>, vector<8x256xf32>
    %8 = arith.mulf %7, %6 : vector<8x256xf32>
    %9 = arith.addf %5, %8 : vector<8x256xf32>
    %c16_i32 = arith.constant 16 : i32
    %10 = tpu.dynamic_rotate %4 by %c16_i32 dim 1 : vector<8x256xf32>, i32 -> vector<8x256xf32>
    %c0_8 = arith.constant 0 : index
    %c256 = arith.constant 256 : index
    %11 = vector.load %arg2[%c0_8, %c256] : memref<8x2310xf32, #tpu.memory_space<vmem>>, vector<8x256xf32>
    %12 = arith.mulf %11, %10 : vector<8x256xf32>
    %13 = arith.addf %9, %12 : vector<8x256xf32>
    %c15_i32 = arith.constant 15 : i32
    %14 = tpu.dynamic_rotate %4 by %c15_i32 dim 1 : vector<8x256xf32>, i32 -> vector<8x256xf32>
    %c0_9 = arith.constant 0 : index
    %c512 = arith.constant 512 : index
    %15 = vector.load %arg2[%c0_9, %c512] : memref<8x2310xf32, #tpu.memory_space<vmem>>, vector<8x256xf32>
    %16 = arith.mulf %15, %14 : vector<8x256xf32>
    %17 = arith.addf %13, %16 : vector<8x256xf32>
    %c1_i32 = arith.constant 1 : i32
    %18 = tpu.dynamic_rotate %4 by %c1_i32 dim 1 : vector<8x256xf32>, i32 -> vector<8x256xf32>
    %c0_10 = arith.constant 0 : index
    %c768 = arith.constant 768 : index
    %19 = vector.load %arg2[%c0_10, %c768] : memref<8x2310xf32, #tpu.memory_space<vmem>>, vector<8x256xf32>
    %20 = arith.mulf %19, %18 : vector<8x256xf32>
    %21 = arith.addf %17, %20 : vector<8x256xf32>
    %c0_11 = arith.constant 0 : index
    %c1024 = arith.constant 1024 : index
    %22 = vector.load %arg2[%c0_11, %c1024] : memref<8x2310xf32, #tpu.memory_space<vmem>>, vector<8x256xf32>
    %23 = arith.mulf %22, %4 : vector<8x256xf32>
    %24 = arith.addf %21, %23 : vector<8x256xf32>
    %c255_i32 = arith.constant 255 : i32
    %25 = tpu.dynamic_rotate %4 by %c255_i32 dim 1 : vector<8x256xf32>, i32 -> vector<8x256xf32>
    %c0_12 = arith.constant 0 : index
    %c1280 = arith.constant 1280 : index
    %26 = vector.load %arg2[%c0_12, %c1280] : memref<8x2310xf32, #tpu.memory_space<vmem>>, vector<8x256xf32>
    %27 = arith.mulf %26, %25 : vector<8x256xf32>
    %28 = arith.addf %24, %27 : vector<8x256xf32>
    %c241_i32 = arith.constant 241 : i32
    %29 = tpu.dynamic_rotate %4 by %c241_i32 dim 1 : vector<8x256xf32>, i32 -> vector<8x256xf32>
    %c0_13 = arith.constant 0 : index
    %c1536 = arith.constant 1536 : index
    %30 = vector.load %arg2[%c0_13, %c1536] : memref<8x2310xf32, #tpu.memory_space<vmem>>, vector<8x256xf32>
    %31 = arith.mulf %30, %29 : vector<8x256xf32>
    %32 = arith.addf %28, %31 : vector<8x256xf32>
    %c240_i32 = arith.constant 240 : i32
    %33 = tpu.dynamic_rotate %4 by %c240_i32 dim 1 : vector<8x256xf32>, i32 -> vector<8x256xf32>
    %c0_14 = arith.constant 0 : index
    %c1792 = arith.constant 1792 : index
    %34 = vector.load %arg2[%c0_14, %c1792] : memref<8x2310xf32, #tpu.memory_space<vmem>>, vector<8x256xf32>
    %35 = arith.mulf %34, %33 : vector<8x256xf32>
    %36 = arith.addf %32, %35 : vector<8x256xf32>
    %c239_i32 = arith.constant 239 : i32
    %37 = tpu.dynamic_rotate %4 by %c239_i32 dim 1 : vector<8x256xf32>, i32 -> vector<8x256xf32>
    %c0_15 = arith.constant 0 : index
    %c2048 = arith.constant 2048 : index
    %38 = vector.load %arg2[%c0_15, %c2048] : memref<8x2310xf32, #tpu.memory_space<vmem>>, vector<8x256xf32>
    %39 = arith.mulf %38, %37 : vector<8x256xf32>
    %40 = arith.addf %36, %39 : vector<8x256xf32>
    %c0_16 = arith.constant 0 : index
    %c2304 = arith.constant 2304 : index
    %41 = vector.load %arg2[%c0_16, %c2304] : memref<8x2310xf32, #tpu.memory_space<vmem>>, vector<8x1xf32>
    %42 = vector.broadcast %41 : vector<8x1xf32> to vector<8x256xf32>
    %43 = arith.addf %40, %42 : vector<8x256xf32>
    %c0_17 = arith.constant 0 : index
    %c2305 = arith.constant 2305 : index
    %44 = vector.load %arg2[%c0_17, %c2305] : memref<8x2310xf32, #tpu.memory_space<vmem>>, vector<4x1xf32>
    %c0_18 = arith.constant 0 : index
    %c2306 = arith.constant 2306 : index
    %45 = vector.load %arg2[%c0_18, %c2306] : memref<8x2310xf32, #tpu.memory_space<vmem>>, vector<4x1xf32>
    %c0_19 = arith.constant 0 : index
    %c2307 = arith.constant 2307 : index
    %46 = vector.load %arg2[%c0_19, %c2307] : memref<8x2310xf32, #tpu.memory_space<vmem>>, vector<4x1xf32>
    %c0_20 = arith.constant 0 : index
    %c2308 = arith.constant 2308 : index
    %47 = vector.load %arg2[%c0_20, %c2308] : memref<8x2310xf32, #tpu.memory_space<vmem>>, vector<4x1xf32>
    %c0_21 = arith.constant 0 : index
    %c2309 = arith.constant 2309 : index
    %48 = vector.load %arg2[%c0_21, %c2309] : memref<8x2310xf32, #tpu.memory_space<vmem>>, vector<4x1xf32>
    %cst_22 = arith.constant 0.000000e+00 : f32
    %49 = vector.broadcast %cst_22 : f32 to vector<4x256xf32>
    %50 = vector.extract_strided_slice %43 {offsets = [0, 0], sizes = [1, 256], strides = [1, 1]} : vector<8x256xf32> to vector<1x256xf32>
    %51 = vector.broadcast %44 : vector<4x1xf32> to vector<4x256xf32>
    %52 = vector.broadcast %50 : vector<1x256xf32> to vector<4x256xf32>
    %53 = arith.mulf %51, %52 : vector<4x256xf32>
    %54 = arith.addf %49, %53 : vector<4x256xf32>
    %55 = vector.extract_strided_slice %43 {offsets = [1, 0], sizes = [1, 256], strides = [1, 1]} : vector<8x256xf32> to vector<1x256xf32>
    %56 = vector.broadcast %45 : vector<4x1xf32> to vector<4x256xf32>
    %57 = vector.broadcast %55 : vector<1x256xf32> to vector<4x256xf32>
    %58 = arith.mulf %56, %57 : vector<4x256xf32>
    %59 = arith.addf %54, %58 : vector<4x256xf32>
    %60 = vector.extract_strided_slice %43 {offsets = [2, 0], sizes = [1, 256], strides = [1, 1]} : vector<8x256xf32> to vector<1x256xf32>
    %61 = vector.broadcast %46 : vector<4x1xf32> to vector<4x256xf32>
    %62 = vector.broadcast %60 : vector<1x256xf32> to vector<4x256xf32>
    %63 = arith.mulf %61, %62 : vector<4x256xf32>
    %64 = arith.addf %59, %63 : vector<4x256xf32>
    %65 = vector.extract_strided_slice %43 {offsets = [3, 0], sizes = [1, 256], strides = [1, 1]} : vector<8x256xf32> to vector<1x256xf32>
    %66 = vector.broadcast %47 : vector<4x1xf32> to vector<4x256xf32>
    %67 = vector.broadcast %65 : vector<1x256xf32> to vector<4x256xf32>
    %68 = arith.mulf %66, %67 : vector<4x256xf32>
    %69 = arith.addf %64, %68 : vector<4x256xf32>
    %70 = vector.broadcast %48 : vector<4x1xf32> to vector<4x256xf32>
    %71 = arith.addf %69, %70 : vector<4x256xf32>
    %cst_23 = arith.constant 0.000000e+00 : f32
    %72 = vector.broadcast %cst_23 : f32 to vector<4x256xf32>
    %73 = vector.extract_strided_slice %43 {offsets = [4, 0], sizes = [1, 256], strides = [1, 1]} : vector<8x256xf32> to vector<1x256xf32>
    %74 = vector.broadcast %44 : vector<4x1xf32> to vector<4x256xf32>
    %75 = vector.broadcast %73 : vector<1x256xf32> to vector<4x256xf32>
    %76 = arith.mulf %74, %75 : vector<4x256xf32>
    %77 = arith.addf %72, %76 : vector<4x256xf32>
    %78 = vector.extract_strided_slice %43 {offsets = [5, 0], sizes = [1, 256], strides = [1, 1]} : vector<8x256xf32> to vector<1x256xf32>
    %79 = vector.broadcast %45 : vector<4x1xf32> to vector<4x256xf32>
    %80 = vector.broadcast %78 : vector<1x256xf32> to vector<4x256xf32>
    %81 = arith.mulf %79, %80 : vector<4x256xf32>
    %82 = arith.addf %77, %81 : vector<4x256xf32>
    %83 = vector.extract_strided_slice %43 {offsets = [6, 0], sizes = [1, 256], strides = [1, 1]} : vector<8x256xf32> to vector<1x256xf32>
    %84 = vector.broadcast %46 : vector<4x1xf32> to vector<4x256xf32>
    %85 = vector.broadcast %83 : vector<1x256xf32> to vector<4x256xf32>
    %86 = arith.mulf %84, %85 : vector<4x256xf32>
    %87 = arith.addf %82, %86 : vector<4x256xf32>
    %88 = vector.extract_strided_slice %43 {offsets = [7, 0], sizes = [1, 256], strides = [1, 1]} : vector<8x256xf32> to vector<1x256xf32>
    %89 = vector.broadcast %47 : vector<4x1xf32> to vector<4x256xf32>
    %90 = vector.broadcast %88 : vector<1x256xf32> to vector<4x256xf32>
    %91 = arith.mulf %89, %90 : vector<4x256xf32>
    %92 = arith.addf %87, %91 : vector<4x256xf32>
    %93 = vector.broadcast %48 : vector<4x1xf32> to vector<4x256xf32>
    %94 = arith.addf %92, %93 : vector<4x256xf32>
    %95 = tpu.concatenate %71, %94 in 0 : vector<4x256xf32>, vector<4x256xf32> -> vector<8x256xf32>
    %c0_24 = arith.constant 0 : index
    %c0_25 = arith.constant 0 : index
    %96 = vector.load %arg3[%c0_24, %c0_25] : memref<8x256xf32, #tpu.memory_space<vmem>>, vector<8x256xf32>
    tpu.vector_store %arg3[%c0_24, %c0_25], %95 {strides = array<i32>} : memref<8x256xf32, #tpu.memory_space<vmem>>, vector<8x256xf32>,
    return
  }
  func.func @transform_0(%arg0: i32) -> (i32, i32, i32, i32) {
    %c0_i32 = arith.constant 0 : i32
    %c2_i32 = arith.constant 2 : i32
    %c0_i32_0 = arith.constant 0 : i32
    %c0_i32_1 = arith.constant 0 : i32
    %c0_i32_2 = arith.constant 0 : i32
    return %c0_i32, %c2_i32, %c0_i32_0, %c0_i32_1 : i32, i32, i32, i32
  }
  func.func @transform_1(%arg0: i32) -> (i32, i32) {
    %c0_i32 = arith.constant 0 : i32
    %c0_i32_0 = arith.constant 0 : i32
    %c0_i32_1 = arith.constant 0 : i32
    return %c0_i32, %c0_i32_0 : i32, i32
  }
  func.func @transform_2(%arg0: i32) -> (i32, i32) {
    %c0_i32 = arith.constant 0 : i32
    %c0_i32_0 = arith.constant 0 : i32
    %c0_i32_1 = arith.constant 0 : i32
    return %c0_i32, %c0_i32_0 : i32, i32
  }
}

</mosaic_0001>

<bundles_post_ra>
// kernel: tpu_custom_call.1
= control target key start
LH: loop header
LB: loop body
LE: loop exit
PB: predicated region body
PF: predicated region fallthrough
CT: control target
= control target key end

     0   :  { %7 = vsyncpa [#allocation3], 0  ;;  %s532_s0 = inlined_call_operand.hbm [shape: f32[2,4,4,256], index: 0, kind: input, shape index: {}]   ;;  %s533_s1 = inlined_call_operand.hbm [shape: f32[8,2310], index: 1, kind: input, shape index: {}]   ;;  %s534_s2 = inlined_call_operand.hbm [shape: f32[8,256], index: 2, kind: output, shape index: {}]  }
   0x1   :  { %8 = vsyncpa [#allocation6], 0 }
   0x2   :  { %9 = vsyncpa [#allocation4], 0  ;;  %s15_s11 = scalar_lea.hbm %s532_s0, 256  ;;  %s423_s12 = smov [#allocation2]  }
   0x3   :  { %s16_s13 = sshll.u32 %s423_s12, 4  ;;  %s372_s16 = scalar_lea.hbm %s532_s0, 512  ;;  %s17_s13 = int_to_ptr.vmem [resolvable:$true] %s16_s13 }
   0x4   :  { %p349_p0 = scmp.ne.s32.totalorder %s15_s11, %s372_s16  ;;  %s350_s19 = scalar_lea.hbm %s532_s0, 1024 }
   0x5   :  { %p351_p1 = scmp.lt.u32.totalorder %s15_s11, %s532_s0  ;;  %p352_p2 = scmp.lt.u32.totalorder %s350_s19, %s372_s16 }
   0x6   :  { %p354_p4 = scmp.lt.u32.totalorder %s372_s16, %s15_s11 }
   0x7   :  { %p353_p3 = por %p352_p2, %p351_p1 }
   0x9   :  { %p355_p5 = por %p354_p4, %p353_p3 }
   0xb   :  { %p356_p6 = pnand %p355_p5, %p349_p0 }
   0xd   :  { %359 = shalt.err (!%p356_p6)
}
   0xe   :  { %s360_s22 = scalar_lea.vmem %s17_s13, 256  ;;  %p365_p8 = scmp.lt.s32.totalorder %s17_s13, %s17_s13 }
   0xf   :  { %p361_p7 = scmp.ne.s32.totalorder %s17_s13, %s360_s22  ;;  %p366_p9 = scmp.lt.s32.totalorder %s360_s22, %s360_s22 }
  0x11   :  { %p367_p10 = por %p366_p9, %p365_p8 }
  0x13   :  { %p368_p11 = pnand %p367_p10, %p361_p7 }
  0x15   :  { %371 = shalt.err (!%p368_p11)
}
  0x16   :  { %s424_s23 = smov 512   ;;  %s425_s24 = smov 128  }
  0x17   :  { %s426_s25 = smov 8   ;;  %s427_s26 = smov [#allocation5]  }
  0x18   :  { %22 = dma.hbm_to_vmem [thread:$0]  %s15_s11, 256, %s17_s13, [#allocation3], %s424_s23, %s425_s24, %s426_s25  }
  0x19   :  { %s29_s27 = sshll.u32 %s427_s26, 4  ;;  %s373_s29 = scalar_lea.hbm %s533_s1, 2432  ;;  %s30_s27 = int_to_ptr.vmem [resolvable:$true] %s29_s27 }
  0x1a   :  { %p374_p12 = scmp.ne.s32.totalorder %s533_s1, %s373_s29  ;;  %p377_p13 = scmp.lt.u32.totalorder %s373_s29, %s533_s1 }
  0x1c   :  { %p379_p0 = pnand %p377_p13, %p374_p12 }
  0x1e   :  { %382 = shalt.err (!%p379_p0)
}
  0x1f   :  { %s383_s6 = scalar_lea.vmem %s30_s27, 2432  ;;  %p388_p2 = scmp.lt.s32.totalorder %s30_s27, %s30_s27 }
  0x20   :  { %p384_p1 = scmp.ne.s32.totalorder %s30_s27, %s383_s6  ;;  %p389_p3 = scmp.lt.s32.totalorder %s383_s6, %s383_s6 }
  0x22   :  { %p390_p4 = por %p389_p3, %p388_p2 }
  0x24   :  { %p391_p5 = pnand %p390_p4, %p384_p1 }
  0x26   :  { %394 = shalt.err (!%p391_p5)
}
  0x27   :  { %32 = dma.hbm_to_vmem [thread:$0]  %s533_s1, 2432, %s30_s27, [#allocation6]  }
  0x28   :  { %417 = dma.done.wait [#allocation3], 256  }
  0x29   :  { %418 = vsyncadd [#allocation3], 4294967040 }
  0x2a   :  { %419 = dma.done.wait [#allocation6], 2432  }
  0x2b   :  { %420 = vsyncadd [#allocation6], 4294964864  ;;  %v428_v0 = vmov 0   ;;  %v429_v1 = vmov 2   ;;  %v39_v2 = vld [vmem:[#allocation2] sm:$0xff]  ;;  %v41_v3 = vld [vmem:[#allocation2 + $0x8] sm:$0xff]  ;;  %v55_v18 = vlaneseq }
  0x2c   :  { %339 = vset.pattern.permute.xlu0 %v428_v0  ;;  %341 = vset.pattern.permute.xlu1 %v429_v1  ;;  %vm48_vm0 = vcmask 1043456   ;;  %v46_v4 = vcombine.low %v41_v3, %v41_v3  ;;  %v43_v5 = vcombine.high %v39_v2, %v39_v2  ;;  %s430_s9 = smov 16   ;;  %s431_s1 = smov 17   ;;  %v163_v8 = vld [vmem:[#allocation5 + $0x90] sm:$0xff]  ;;  %v438_v10 = vmov 1   ;;  %v74_v25 = vld [vmem:[#allocation5 + $0x18] sm:$0xff] }
  0x2d   :  { %s432_s10 = smov 15   ;;  %s433_s11 = smov 1   ;;  %v171_v9 = vld [vmem:[#allocation5 + $0x90] sm:$0xf]  ;;  %v439_v11 = vmov 4   ;;  %v440_v12 = vmov 3  }
  0x2e   :  { %v483_v6 = vsel %vm48_vm0, %v39_v2, %v46_v4  ;;  %v488_v7 = vsel %vm48_vm0, %v43_v5, %v41_v3  ;;  %s434_s12 = smov 127   ;;  %s435_s13 = smov 113   ;;  %v441_v13 = vmov 5   ;;  %v505_v21 = vand.u32 127, %v55_v18  ;;  %v73_v24 = vld [vmem:[#allocation5 + $0x10] sm:$0xff]  ;;  %v60_v28 = vld [vmem:[#allocation5] sm:$0xff] }
  0x2f   :  { %66 = vrot.lane.b32.xlu1 %v483_v6, %s430_s9  ;;  %51 = vrot.lane.b32.xlu0 %v483_v6, %s431_s1  ;;  %s436_s14 = smov 112   ;;  %s437_s15 = smov 111   ;;  %v61_v29 = vld [vmem:[#allocation5 + $0x8] sm:$0xff]  ;;  %v86_v34 = vld [vmem:[#allocation5 + $0x20] sm:$0xff]  ;;  %v99_v42 = vld [vmem:[#allocation5 + $0x30] sm:$0xff] }
  0x30   :  { %vm70_vm1 = vcmp.lt.s32.totalorder %v505_v21, 16  ;;  %vm57_vm2 = vcmp.lt.s32.totalorder %v505_v21, 17  ;;  %vm83_vm3 = vcmp.lt.s32.totalorder %v505_v21, 15  ;;  %vm96_vm4 = vcmp.lt.s32.totalorder %v505_v21, 1  ;;  %v87_v35 = vld [vmem:[#allocation5 + $0x28] sm:$0xff]  ;;  %v100_v43 = vld [vmem:[#allocation5 + $0x38] sm:$0xff] }
  0x31   :  { %v105_v53 = vld [vmem:[#allocation5 + $0x40] sm:$0xff]  ;;  %v106_v55 = vld [vmem:[#allocation5 + $0x48] sm:$0xff]  ;;  %vm115_vm5 = vcmp.lt.s32.totalorder %v505_v21, 127  ;;  %vm128_vm6 = vcmp.lt.s32.totalorder %v505_v21, 113  ;;  %v118_v63 = vld [vmem:[#allocation5 + $0x50] sm:$0xff]  ;;  %vm141_vm7 = vcmp.lt.s32.totalorder %v505_v21, 112 }
  0x32   :  { %v107_v59 = vmul.f32 %v105_v53, %v483_v6  ;;  %v108_v62 = vmul.f32 %v106_v55, %v488_v7  ;;  %v119_v0 = vld [vmem:[#allocation5 + $0x58] sm:$0xff]  ;;  %v131_v5 = vld [vmem:[#allocation5 + $0x60] sm:$0xff]  ;;  %vm154_vm8 = vcmp.lt.s32.totalorder %v505_v21, 111  ;;  %s442_s16 = smov [#allocation7]  }
  0x33   :  { %68 = vrot.lane.b32.xlu1 %v488_v7, %s430_s9  ;;  %53 = vrot.lane.b32.xlu0 %v488_v7, %s431_s1  ;;  %s309_s17 = sshll.u32 %s442_s16, 4  ;;  %s310_s17 = int_to_ptr.vmem [resolvable:$true] %s309_s17 }
  0x34   :  { %s395_s18 = scalar_lea.vmem %s310_s17, 256  ;;  %p400_p7 = scmp.lt.s32.totalorder %s310_s17, %s310_s17 }
  0x35   :  { %p396_p6 = scmp.ne.s32.totalorder %s310_s17, %s395_s18  ;;  %p401_p8 = scmp.lt.s32.totalorder %s395_s18, %s395_s18 }
  0x37   :  { %81 = vrot.lane.b32.xlu1 %v488_v7, %s432_s10  ;;  %79 = vrot.lane.b32.xlu0 %v483_v6, %s432_s10  ;;  %p402_p9 = por %p401_p8, %p400_p7 }
  0x39   :  { %p403_p10 = pnand %p402_p9, %p396_p6 }
  0x3b   :  { %94 = vrot.lane.b32.xlu1 %v488_v7, %s433_s11  ;;  %92 = vrot.lane.b32.xlu0 %v483_v6, %s433_s11 }
  0x3f   :  { %113 = vrot.lane.b32.xlu1 %v488_v7, %s434_s12  ;;  %111 = vrot.lane.b32.xlu0 %v483_v6, %s434_s12 }
  0x43   :  { %126 = vrot.lane.b32.xlu1 %v488_v7, %s435_s13  ;;  %124 = vrot.lane.b32.xlu0 %v483_v6, %s435_s13 }
  0x47   :  { %139 = vrot.lane.b32.xlu1 %v488_v7, %s436_s14  ;;  %137 = vrot.lane.b32.xlu0 %v483_v6, %s436_s14 }
  0x4b   :  { %150 = vrot.lane.b32.xlu1 %v483_v6, %s437_s15  ;;  %166 = vperm.xlu0 %339, %v163_v8   ;;  %v132_v8 = vld [vmem:[#allocation5 + $0x68] sm:$0xff] }
  0x4f   :  { %152 = vrot.lane.b32.xlu1 %v488_v7, %s437_s15  ;;  %340 = vset.pattern.permute.xlu0 %v438_v10 }
  0x50   :  { %174 = vperm.xlu0 %340, %v171_v9  }
  0x53   :  { %190 = vperm.xlu1 %341, %v171_v9  }
  0x54   :  { %343 = vset.pattern.permute.xlu0 %v439_v11 }
  0x55   :  { %222 = vperm.xlu0 %343, %v171_v9  }
  0x57   :  { %342 = vset.pattern.permute.xlu1 %v440_v12 }
  0x58   :  { %206 = vperm.xlu1 %342, %v171_v9  }
  0x59   :  { %345 = vset.pattern.permute.xlu0 %v441_v13 }
  0x5c   :  { %344 = vset.pattern.permute.xlu1 %v441_v13  ;;  %v144_v13 = vld [vmem:[#allocation5 + $0x70] sm:$0xff] }
  0x5d   :  { %238 = vperm.xlu1 %344, %v171_v9  }
  0xa1   :  { %v67_v14 = vpop.permute.xlu1 %66  ;;  %v52_v15 = vpop.permute.xlu0 %51 }
  0xa5   :  { %v69_v16 = vpop.permute.xlu1 %68  ;;  %v54_v17 = vpop.permute.xlu0 %53 }
  0xa6   :  { %v71_v26 = vsel %vm70_vm1, %v67_v14, %v69_v16  ;;  %v72_v27 = vsel %vm70_vm1, %v69_v16, %v67_v14  ;;  %v58_v30 = vsel %vm57_vm2, %v52_v15, %v54_v17  ;;  %v59_v31 = vsel %vm57_vm2, %v54_v17, %v52_v15  ;;  %v145_v14 = vld [vmem:[#allocation5 + $0x78] sm:$0xff] }
  0xa7   :  { %v75_v38 = vmul.f32 %v73_v24, %v72_v27  ;;  %v76_v39 = vmul.f32 %v74_v25, %v71_v26  ;;  %v62_v40 = vmul.f32 %v60_v28, %v59_v31  ;;  %v63_v41 = vmul.f32 %v61_v29, %v58_v30 }
  0xa9   :  { %v82_v19 = vpop.permute.xlu1 %81  ;;  %v80_v20 = vpop.permute.xlu0 %79  ;;  %v77_v49 = vadd.f32 %v75_v38, %v62_v40  ;;  %v78_v50 = vadd.f32 %v76_v39, %v63_v41 }
  0xaa   :  { %v84_v36 = vsel %vm83_vm3, %v80_v20, %v82_v19  ;;  %v85_v37 = vsel %vm83_vm3, %v82_v19, %v80_v20 }
  0xab   :  { %v88_v47 = vmul.f32 %v86_v34, %v85_v37  ;;  %v89_v48 = vmul.f32 %v87_v35, %v84_v36 }
  0xad   :  { %v95_v22 = vpop.permute.xlu1 %94  ;;  %v93_v23 = vpop.permute.xlu0 %92  ;;  %v90_v57 = vadd.f32 %v88_v47, %v77_v49  ;;  %v91_v58 = vadd.f32 %v89_v48, %v78_v50 }
  0xae   :  { %v97_v44 = vsel %vm96_vm4, %v93_v23, %v95_v22  ;;  %v98_v45 = vsel %vm96_vm4, %v95_v22, %v93_v23  ;;  %v157_v22 = vld [vmem:[#allocation5 + $0x80] sm:$0xff]  ;;  %v158_v23 = vld [vmem:[#allocation5 + $0x88] sm:$0xff] }
  0xaf   :  { %v101_v51 = vmul.f32 %v99_v42, %v98_v45  ;;  %v102_v52 = vmul.f32 %v100_v43, %v97_v44 }
  0xb1   :  { %v114_v32 = vpop.permute.xlu1 %113  ;;  %v112_v33 = vpop.permute.xlu0 %111  ;;  %v103_v60 = vadd.f32 %v101_v51, %v90_v57  ;;  %v104_v61 = vadd.f32 %v102_v52, %v91_v58 }
  0xb2   :  { %v116_v1 = vsel %vm115_vm5, %v112_v33, %v114_v32  ;;  %v117_v2 = vsel %vm115_vm5, %v114_v32, %v112_v33  ;;  %v178_v33 = vshrl.u32 %v55_v18, 7 }
  0xb3   :  { %v109_v6 = vadd.f32 %v107_v59, %v103_v60  ;;  %v110_v11 = vadd.f32 %v108_v62, %v104_v61  ;;  %v120_v12 = vmul.f32 %v118_v63, %v116_v1  ;;  %v121_v7 = vmul.f32 %v119_v0, %v117_v2 }
  0xb4   :  { %v179_v41 = vsub.s32 0, %v178_v33  ;;  %v245_v42 = vsub.s32 4, %v178_v33  ;;  %v195_v43 = vsub.s32 1, %v178_v33  ;;  %v257_v44 = vsub.s32 5, %v178_v33 }
  0xb5   :  { %v127_v46 = vpop.permute.xlu1 %126  ;;  %v125_v54 = vpop.permute.xlu0 %124  ;;  %v122_v26 = vadd.f32 %v120_v12, %v109_v6  ;;  %v123_v27 = vadd.f32 %v121_v7, %v110_v11  ;;  %v227_v45 = vsub.s32 3, %v178_v33  ;;  %v269_v57 = vsub.s32 6, %v178_v33 }
  0xb6   :  { %v129_v9 = vsel %vm128_vm6, %v125_v54, %v127_v46  ;;  %v130_v10 = vsel %vm128_vm6, %v127_v46, %v125_v54  ;;  %v281_v46 = vsub.s32 7, %v178_v33 }
  0xb7   :  { %v133_v19 = vmul.f32 %v131_v5, %v129_v9  ;;  %v134_v20 = vmul.f32 %v132_v8, %v130_v10 }
  0xb9   :  { %v140_v56 = vpop.permute.xlu1 %139  ;;  %v138_v4 = vpop.permute.xlu0 %137  ;;  %v135_v21 = vadd.f32 %v133_v19, %v122_v26  ;;  %v136_v30 = vadd.f32 %v134_v20, %v123_v27 }
  0xba   :  { %v142_v15 = vsel %vm141_vm7, %v138_v4, %v140_v56  ;;  %v143_v16 = vsel %vm141_vm7, %v140_v56, %v138_v4  ;;  %v211_v56 = vsub.s32 2, %v178_v33 }
  0xbb   :  { %v146_v28 = vmul.f32 %v144_v13, %v142_v15  ;;  %v147_v29 = vmul.f32 %v145_v14, %v143_v16 }
  0xbd   :  { %v151_v3 = vpop.permute.xlu1 %150  ;;  %v148_v34 = vadd.f32 %v146_v28, %v135_v21  ;;  %v149_v35 = vadd.f32 %v147_v29, %v136_v30 }
  0xc1   :  { %v153_v17 = vpop.permute.xlu1 %152 }
  0xc2   :  { %v155_v24 = vsel %vm154_vm8, %v151_v3, %v153_v17  ;;  %v156_v25 = vsel %vm154_vm8, %v153_v17, %v151_v3 }
  0xc3   :  { %v159_v31 = vmul.f32 %v157_v22, %v155_v24  ;;  %v160_v32 = vmul.f32 %v158_v23, %v156_v25 }
  0xc5   :  { %v161_v36 = vadd.f32 %v159_v31, %v148_v34  ;;  %v162_v38 = vadd.f32 %v160_v32, %v149_v35 }
  0xca   :  { %v167_v37 = vpop.permute.xlu0 %166 }
  0xcb   :  { %v169_v39 = vadd.f32 %v167_v37, %v161_v36  ;;  %v170_v40 = vadd.f32 %v167_v37, %v162_v38 }
  0xcd   :  { %v180_v47 = vrot.slane %v169_v39, %v179_v41  ;;  %v246_v48 = vrot.slane %v169_v39, %v245_v42  ;;  %v184_v50 = vrot.slane %v170_v40, %v179_v41  ;;  %v250_v51 = vrot.slane %v170_v40, %v245_v42 }
  0xce   :  { %v196_v52 = vrot.slane %v169_v39, %v195_v43  ;;  %v200_v18 = vrot.slane %v170_v40, %v195_v43  ;;  %v258_v53 = vrot.slane %v169_v39, %v257_v44  ;;  %v262_v54 = vrot.slane %v170_v40, %v257_v44 }
  0xcf   :  { %v175_v49 = vpop.permute.xlu0 %174  ;;  %v228_v62 = vrot.slane %v169_v39, %v227_v45  ;;  %v282_v63 = vrot.slane %v169_v39, %v281_v46  ;;  %v232_v0 = vrot.slane %v170_v40, %v227_v45  ;;  %v286_v1 = vrot.slane %v170_v40, %v281_v46 }
  0xd0   :  { %v185_v2 = vmul.f32 %v180_v47, %v175_v49  ;;  %v186_v3 = vmul.f32 %v184_v50, %v175_v49  ;;  %v251_v4 = vmul.f32 %v246_v48, %v175_v49  ;;  %v252_v5 = vmul.f32 %v250_v51, %v175_v49 }
  0xd1   :  { %v212_v9 = vrot.slane %v169_v39, %v211_v56  ;;  %v216_v10 = vrot.slane %v170_v40, %v211_v56  ;;  %v270_v6 = vrot.slane %v169_v39, %v269_v57  ;;  %v274_v11 = vrot.slane %v170_v40, %v269_v57 }
  0xd2   :  { %v191_v55 = vpop.permute.xlu1 %190 }
  0xd3   :  { %v201_v58 = vmul.f32 %v196_v52, %v191_v55  ;;  %v202_v59 = vmul.f32 %v200_v18, %v191_v55  ;;  %v263_v60 = vmul.f32 %v258_v53, %v191_v55  ;;  %v264_v61 = vmul.f32 %v262_v54, %v191_v55 }
  0xd4   :  { %v223_v8 = vpop.permute.xlu0 %222 }
  0xd5   :  { %v203_v12 = vadd.f32 %v201_v58, %v185_v2  ;;  %v204_v7 = vadd.f32 %v202_v59, %v186_v3  ;;  %v265_v13 = vadd.f32 %v263_v60, %v251_v4  ;;  %v266_v14 = vadd.f32 %v264_v61, %v252_v5 }
  0xd6   :  { %v233_v22 = vmul.f32 %v228_v62, %v223_v8  ;;  %v234_v23 = vmul.f32 %v232_v0, %v223_v8  ;;  %v287_v24 = vmul.f32 %v282_v63, %v223_v8  ;;  %v288_v25 = vmul.f32 %v286_v1, %v223_v8 }
  0xd7   :  { %v207_v15 = vpop.permute.xlu1 %206 }
  0xd8   :  { %v217_v16 = vmul.f32 %v212_v9, %v207_v15  ;;  %v218_v17 = vmul.f32 %v216_v10, %v207_v15  ;;  %v275_v19 = vmul.f32 %v270_v6, %v207_v15  ;;  %v276_v20 = vmul.f32 %v274_v11, %v207_v15 }
  0xda   :  { %v219_v26 = vadd.f32 %v217_v16, %v203_v12  ;;  %v220_v27 = vadd.f32 %v218_v17, %v204_v7  ;;  %v277_v28 = vadd.f32 %v275_v19, %v265_v13  ;;  %v278_v29 = vadd.f32 %v276_v20, %v266_v14 }
  0xdc   :  { %v239_v21 = vpop.permute.xlu1 %238  ;;  %v235_v30 = vadd.f32 %v233_v22, %v219_v26  ;;  %v236_v31 = vadd.f32 %v234_v23, %v220_v27  ;;  %v289_v32 = vadd.f32 %v287_v24, %v277_v28  ;;  %v290_v33 = vadd.f32 %v288_v25, %v278_v29 }
  0xde   :  { %v291_v34 = vadd.f32 %v289_v32, %v239_v21  ;;  %v292_v35 = vadd.f32 %v290_v33, %v239_v21  ;;  %v241_v36 = vadd.f32 %v239_v21, %v235_v30  ;;  %v242_v37 = vadd.f32 %v239_v21, %v236_v31 }
  0xe0   :  { %v295_v38 = vrot.slane %v291_v34, 4  ;;  %v296_v39 = vrot.slane %v292_v35, 4 }
  0xe2   :  { %v299_v40 = vsel %vm48_vm0, %v241_v36, %v295_v38  ;;  %v300_v41 = vsel %vm48_vm0, %v242_v37, %v296_v39 }
  0xe3   :  { %301 = vst [vmem:[#allocation7] sm:$0xff] %v299_v40  ;;  %302 = vst [vmem:[#allocation7 + $0x8] sm:$0xff] %v300_v41 }
  0xe4   :  { %406 = shalt.err (!%p403_p10)
}
  0xe5   :  { %s407_s21 = scalar_lea.hbm %s534_s2, 256 }
  0xe6   :  { %p408_p11 = scmp.ne.s32.totalorder %s534_s2, %s407_s21  ;;  %p411_p12 = scmp.lt.u32.totalorder %s407_s21, %s534_s2 }
  0xe8   :  { %p413_p13 = pnand %p411_p12, %p408_p11 }
  0xea   :  { %416 = shalt.err (!%p413_p13)
}
  0xeb   :  { %312 = dma.vmem_to_hbm [thread:$0]  %s310_s17, 256, %s534_s2, [#allocation4]  }
  0xec   :  { %421 = dma.done.wait [#allocation4], 256  }
  0xed   :  { %422 = vsyncadd [#allocation4], 4294967040 }
  0xee   :  { %316 = vsyncpa [#allocation3], 1 }
  0xef   :  { %317 = vsyncpa [#allocation6], 1 }
  0xf0   :  { %318 = vsyncpa [#allocation4], 1 }

</bundles_post_ra>
